<compile_context>
chip_gen: v5e
topology: v5e:2x2
jax: 0.10.0
libtpu: 0.0.40
codegen_flags: <defaults>
</compile_context>

<pallas_src>
import jax
import jax.numpy as jnp
from jax.experimental import pallas as pl
from jax.experimental.pallas import tpu as pltpu

LN_EPS = 1e-5  # torch.nn.LayerNorm default


def _round_up(a: int, b: int) -> int:
    return (a + b - 1) // b * b


def _prenorm_linear_kernel(x_ref, g_ref, b_ref, w_ref, bias_ref, o_ref):
    """One (row_tile, col_tile) output block.

    x_ref:    (TR, D)   input rows
    g_ref:    (1, D)    LayerNorm gamma (f32)
    b_ref:    (1, D)    LayerNorm beta  (f32)
    w_ref:    (D, TN)   Linear weight slice (native dtype, e.g. bf16)
    bias_ref: (1, TN)   Linear bias slice (f32)
    o_ref:    (TR, TN)  output block
    """
    x = x_ref[...].astype(jnp.float32)

    # LayerNorm over the last axis (biased variance, like torch.nn.LayerNorm),
    # statistics in f32.
    mean = jnp.mean(x, axis=-1, keepdims=True)
    centered = x - mean
    var = jnp.mean(centered * centered, axis=-1, keepdims=True)
    inv = jax.lax.rsqrt(var + LN_EPS)
    y = centered * inv * g_ref[...] + b_ref[...]

    # MXU matmul in the weights' native dtype (bf16 fast path), f32 accumulation.
    y = y.astype(w_ref.dtype)
    out = jnp.dot(y, w_ref[...], preferred_element_type=jnp.float32)
    out = out + bias_ref[...]
    o_ref[...] = out.astype(o_ref.dtype)


def prenorm_linear(x, gamma, beta, w, bias, *, row_tile=None, col_tile=None,
                   vmem_limit_bytes=None):
    """PreNorm(dim, Linear(dim, hidden)) forward.

    x:     (B, N, D)
    gamma: (D,), beta: (D,)            -- LayerNorm params
    w:     (H, D) (PyTorch Linear layout), bias: (H,)
    returns (B, N, H) in x.dtype.
    """
    B, N, D = x.shape
    H = w.shape[0]
    rows = B * N
    itemsize = jnp.dtype(x.dtype).itemsize

    # ---- tile selection --------------------------------------------------
    # Row tile: big enough to amortize per-step overhead / feed the MXU, small
    # enough that double-buffered x/out blocks fit the default scoped-VMEM
    # budget on every generation (v7x: 64 MiB physical, 32 MiB default scoped).
    if row_tile is None:
        row_tile = 512 if itemsize >= 4 else 1024
    tr = min(row_tile, _round_up(rows, 8))
    tr = _round_up(tr, 8)                       # sublane alignment
    rows_pad = _round_up(rows, tr)

    # Hidden tile: keep W fully resident for typical ViT sizes; tile very wide
    # hidden dims so the (D, tn) W slice and (tr, tn) output block stay small.
    # Always a multiple of 128 lanes so stores are full-lane, unmasked vst.
    if col_tile is None:
        col_tile = H if H <= 4096 else 1024
    tn = _round_up(min(col_tile, H), 128)
    H_pad = _round_up(H, tn)

    n_i = rows_pad // tr
    n_j = H_pad // tn

    # ---- host-side layout prep --------------------------------------------
    x2 = x.reshape(rows, D)
    if rows_pad != rows:
        x2 = jnp.pad(x2, ((0, rows_pad - rows), (0, 0)))

    w_t = w.T                                    # (D, H): kernel does y @ W^T
    bias_p = bias
    if H_pad != H:
        w_t = jnp.pad(w_t, ((0, 0), (0, H_pad - H)))
        bias_p = jnp.pad(bias_p, (0, H_pad - H))

    gamma2 = gamma.astype(jnp.float32).reshape(1, D)
    beta2 = beta.astype(jnp.float32).reshape(1, D)
    bias2 = bias_p.astype(jnp.float32).reshape(1, H_pad)

    # W is reused by every row tile; when it is fully resident (constant
    # index_map) single-buffer it to halve its VMEM footprint.
    if n_j == 1:
        w_spec = pl.BlockSpec((D, tn), lambda j, i: (0, j),
                              pipeline_mode=pl.Buffered(1))
    else:
        w_spec = pl.BlockSpec((D, tn), lambda j, i: (0, j))

    cp_kwargs = dict(dimension_semantics=("parallel", "parallel"))
    if vmem_limit_bytes is not None:
        cp_kwargs["vmem_limit_bytes"] = vmem_limit_bytes

    out2 = pl.pallas_call(
        _prenorm_linear_kernel,
        out_shape=jax.ShapeDtypeStruct((rows_pad, H_pad), x.dtype),
        grid_spec=pltpu.PrefetchScalarGridSpec(
            num_scalar_prefetch=0,
            grid=(n_j, n_i),                     # hidden tiles outer, rows inner
            in_specs=[
                pl.BlockSpec((tr, D), lambda j, i: (i, 0)),   # x rows
                pl.BlockSpec((1, D), lambda j, i: (0, 0)),    # gamma (f32)
                pl.BlockSpec((1, D), lambda j, i: (0, 0)),    # beta  (f32)
                w_spec,                                       # W^T slice
                pl.BlockSpec((1, tn), lambda j, i: (0, j)),   # bias (f32)
            ],
            out_specs=pl.BlockSpec((tr, tn), lambda j, i: (i, j)),
        ),
        compiler_params=pltpu.CompilerParams(**cp_kwargs),
    )(x2, gamma2, beta2, w_t, bias2)

    return out2[:rows, :H].reshape(B, N, H)


def prenorm_linear_ref(x, gamma, beta, w, bias):
    """Pure-JAX reference mirroring the kernel's math: Linear(LayerNorm(x))."""
    xf = x.astype(jnp.float32)
    mean = jnp.mean(xf, axis=-1, keepdims=True)
    var = jnp.mean((xf - mean) ** 2, axis=-1, keepdims=True)
    y = (xf - mean) * jax.lax.rsqrt(var + LN_EPS)
    y = y * gamma.astype(jnp.float32) + beta.astype(jnp.float32)
    y = y.astype(w.dtype)
    out = jnp.dot(y, w.T, preferred_element_type=jnp.float32)
    out = out + bias.astype(jnp.float32)
    return out.astype(x.dtype)


if __name__ == "__main__":
    key = jax.random.PRNGKey(0)
    kx, kg, kb, kw, kbias = jax.random.split(key, 5)

    # Small but lane-aligned shapes (dim / hidden multiples of 128) so the MXU
    # and the store path are exercised the way real ViT sizes would be.
    B, N, D, H = 2, 8, 128, 256

    x = jax.random.normal(kx, (B, N, D), dtype=jnp.float32)
    gamma = 1.0 + 0.1 * jax.random.normal(kg, (D,), dtype=jnp.float32)
    beta = 0.1 * jax.random.normal(kb, (D,), dtype=jnp.float32)
    w = jax.random.normal(kw, (H, D), dtype=jnp.float32) / jnp.sqrt(D)
    bias = 0.1 * jax.random.normal(kbias, (H,), dtype=jnp.float32)

    # f32 path.
    out = jax.block_until_ready(prenorm_linear(x, gamma, beta, w, bias))
    ref = prenorm_linear_ref(x, gamma, beta, w, bias)
    assert out.shape == (B, N, H), out.shape
    assert jnp.allclose(out, ref, atol=1e-3, rtol=1e-3), (
        float(jnp.max(jnp.abs(out - ref))))

    # bf16 path with a row count that is not a multiple of the tile
    # (exercises tail-row padding + bf16 MXU operands with f32 accumulation).
    B2, N2 = 2, 9
    xb = jax.random.normal(kx, (B2, N2, D), dtype=jnp.float32).astype(jnp.bfloat16)
    gb, bb = gamma.astype(jnp.bfloat16), beta.astype(jnp.bfloat16)
    wb, biasb = w.astype(jnp.bfloat16), bias.astype(jnp.bfloat16)

    outb = jax.block_until_ready(prenorm_linear(xb, gb, bb, wb, biasb))
    refb = prenorm_linear_ref(xb, gb, bb, wb, biasb)
    assert outb.shape == (B2, N2, H), outb.shape
    err = float(jnp.max(jnp.abs(outb.astype(jnp.float32) - refb.astype(jnp.float32))))
    assert err < 5e-2, err

    print("KERNEL_OK")
</pallas_src>

<mosaic_0001>
module attributes {stable_mosaic.version = 11 : i64} {
  func.func @_prenorm_linear_kernel(%arg0: i32, %arg1: i32, %arg2: memref<16x128xf32, #tpu.memory_space<vmem>>, %arg3: memref<1x128xf32, #tpu.memory_space<vmem>>, %arg4: memref<1x128xf32, #tpu.memory_space<vmem>>, %arg5: memref<128x256xf32, #tpu.memory_space<vmem>>, %arg6: memref<1x256xf32, #tpu.memory_space<vmem>>, %arg7: memref<16x256xf32, #tpu.memory_space<vmem>>) attributes {dimension_semantics = [#tpu.dimension_semantics<parallel>, #tpu.dimension_semantics<parallel>], iteration_bounds = array<i64: 1, 1>, scalar_prefetch = 0 : i64, scratch_operands = 0 : i64, tpu.core_type = #tpu.core_type<tc>, window_params = [{transform_indices = @transform_0, window_bounds = array<i64: 16, 128>}, {pipeline_mode = #tpu.pipeline_mode<synchronous>, transform_indices = @transform_1, window_bounds = array<i64: 1, 128>}, {pipeline_mode = #tpu.pipeline_mode<synchronous>, transform_indices = @transform_2, window_bounds = array<i64: 1, 128>}, {pipeline_mode = #tpu.pipeline_mode<synchronous>, transform_indices = @transform_3, window_bounds = array<i64: 128, 256>}, {transform_indices = @transform_4, window_bounds = array<i64: 1, 256>}, {transform_indices = @transform_5, window_bounds = array<i64: 16, 256>}]} {
    %c0 = arith.constant 0 : index
    %c0_0 = arith.constant 0 : index
    %0 = vector.load %arg2[%c0, %c0_0] : memref<16x128xf32, #tpu.memory_space<vmem>>, vector<16x128xf32>
    %cst = arith.constant dense<0.000000e+00> : vector<16xf32>
    %1 = vector.multi_reduction <add>, %0, %cst [1] : vector<16x128xf32> to vector<16xf32>
    %2 = vector.shape_cast %1 : vector<16xf32> to vector<16x1xf32>
    %cst_1 = arith.constant 1.280000e+02 : f32
    %3 = vector.broadcast %cst_1 : f32 to vector<16x1xf32>
    %4 = arith.divf %2, %3 : vector<16x1xf32>
    %5 = vector.broadcast %4 : vector<16x1xf32> to vector<16x128xf32>
    %6 = arith.subf %0, %5 : vector<16x128xf32>
    %7 = arith.mulf %6, %6 : vector<16x128xf32>
    %cst_2 = arith.constant dense<0.000000e+00> : vector<16xf32>
    %8 = vector.multi_reduction <add>, %7, %cst_2 [1] : vector<16x128xf32> to vector<16xf32>
    %9 = vector.shape_cast %8 : vector<16xf32> to vector<16x1xf32>
    %cst_3 = arith.constant 1.280000e+02 : f32
    %10 = vector.broadcast %cst_3 : f32 to vector<16x1xf32>
    %11 = arith.divf %9, %10 : vector<16x1xf32>
    %cst_4 = arith.constant 9.99999974E-6 : f32
    %12 = vector.broadcast %cst_4 : f32 to vector<16x1xf32>
    %13 = arith.addf %11, %12 : vector<16x1xf32>
    %14 = math.rsqrt %13 : vector<16x1xf32>
    %15 = vector.broadcast %14 : vector<16x1xf32> to vector<16x128xf32>
    %16 = arith.mulf %6, %15 : vector<16x128xf32>
    %c0_5 = arith.constant 0 : index
    %c0_6 = arith.constant 0 : index
    %17 = vector.load %arg3[%c0_5, %c0_6] : memref<1x128xf32, #tpu.memory_space<vmem>>, vector<1x128xf32>
    %18 = vector.broadcast %17 : vector<1x128xf32> to vector<16x128xf32>
    %19 = arith.mulf %16, %18 : vector<16x128xf32>
    %c0_7 = arith.constant 0 : index
    %c0_8 = arith.constant 0 : index
    %20 = vector.load %arg4[%c0_7, %c0_8] : memref<1x128xf32, #tpu.memory_space<vmem>>, vector<1x128xf32>
    %21 = vector.broadcast %20 : vector<1x128xf32> to vector<16x128xf32>
    %22 = arith.addf %19, %21 : vector<16x128xf32>
    %c0_9 = arith.constant 0 : index
    %c0_10 = arith.constant 0 : index
    %23 = vector.load %arg5[%c0_9, %c0_10] : memref<128x256xf32, #tpu.memory_space<vmem>>, vector<128x256xf32>
    %cst_11 = arith.constant dense<0.000000e+00> : vector<16x256xf32>
    %24 = tpu.matmul %22, %23, %cst_11 {dimension_numbers = #tpu.dot_dimension_numbers<[1], [0], [0], [1], [0, 0, 1, 1], [], []>} : vector<16x128xf32>, vector<128x256xf32>, vector<16x256xf32> -> vector<16x256xf32>
    %c0_12 = arith.constant 0 : index
    %c0_13 = arith.constant 0 : index
    %25 = vector.load %arg6[%c0_12, %c0_13] : memref<1x256xf32, #tpu.memory_space<vmem>>, vector<1x256xf32>
    %26 = vector.broadcast %25 : vector<1x256xf32> to vector<16x256xf32>
    %27 = arith.addf %24, %26 : vector<16x256xf32>
    %c0_14 = arith.constant 0 : index
    %c0_15 = arith.constant 0 : index
    %28 = vector.load %arg7[%c0_14, %c0_15] : memref<16x256xf32, #tpu.memory_space<vmem>>, vector<16x256xf32>
    tpu.vector_store %arg7[%c0_14, %c0_15], %27 {strides = array<i32>} : memref<16x256xf32, #tpu.memory_space<vmem>>, vector<16x256xf32>,
    return
  }
  func.func @transform_0(%arg0: i32, %arg1: i32) -> (i32, i32) {
    %c0_i32 = arith.constant 0 : i32
    %c0_i32_0 = arith.constant 0 : i32
    return %arg1, %c0_i32 : i32, i32
  }
  func.func @transform_1(%arg0: i32, %arg1: i32) -> (i32, i32) {
    %c0_i32 = arith.constant 0 : i32
    %c0_i32_0 = arith.constant 0 : i32
    %c0_i32_1 = arith.constant 0 : i32
    return %c0_i32, %c0_i32_0 : i32, i32
  }
  func.func @transform_2(%arg0: i32, %arg1: i32) -> (i32, i32) {
    %c0_i32 = arith.constant 0 : i32
    %c0_i32_0 = arith.constant 0 : i32
    %c0_i32_1 = arith.constant 0 : i32
    return %c0_i32, %c0_i32_0 : i32, i32
  }
  func.func @transform_3(%arg0: i32, %arg1: i32) -> (i32, i32) {
    %c0_i32 = arith.constant 0 : i32
    %c0_i32_0 = arith.constant 0 : i32
    return %c0_i32, %arg0 : i32, i32
  }
  func.func @transform_4(%arg0: i32, %arg1: i32) -> (i32, i32) {
    %c0_i32 = arith.constant 0 : i32
    %c0_i32_0 = arith.constant 0 : i32
    return %c0_i32, %arg0 : i32, i32
  }
  func.func @transform_5(%arg0: i32, %arg1: i32) -> (i32, i32) {
    %c0_i32 = arith.constant 0 : i32
    return %arg1, %arg0 : i32, i32
  }
}

</mosaic_0001>

<bundles_post_ra>
// kernel: tpu_custom_call.1
= control target key start
LH: loop header
LB: loop body
LE: loop exit
PB: predicated region body
PF: predicated region fallthrough
CT: control target
= control target key end

     0   :  { %10 = vsyncpa [#allocation3], 0  ;;  %s465_s0 = inlined_call_operand.hbm [shape: f32[16,128], index: 0, kind: input, shape index: {}]   ;;  %s466_s1 = inlined_call_operand.hbm [shape: f32[1,128], index: 1, kind: input, shape index: {}]   ;;  %s467_s2 = inlined_call_operand.vmem [shape: f32[1,128], index: 2, kind: input, shape index: {}]   ;;  %s468_s3 = inlined_call_operand.hbm [shape: f32[128,256], index: 3, kind: input, shape index: {}]   ;;  %s469_s4 = inlined_call_operand.vmem [shape: f32[1,256], index: 4, kind: input, shape index: {}]   ;;  %s470_s5 = inlined_call_operand.hbm [shape: f32[16,256], index: 5, kind: output, shape index: {}]  }
   0x1   :  { %11 = vsyncpa [#allocation6], 0  ;;  %s31_s20 = sshll.u32 %s466_s1, 4  ;;  %s32_s20 = int_to_ptr.hbm [resolvable:$true] %s31_s20 }
   0x2   :  { %12 = vsyncpa [#allocation4], 0  ;;  %s386_s21 = smov [#allocation5]   ;;  %s17_s25 = sshll.u32 %s465_s0, 4  ;;  %s18_s25 = int_to_ptr.hbm [resolvable:$true] %s17_s25 }
   0x3   :  { %s33_s22 = sshll.u32 %s386_s21, 4  ;;  %s387_s26 = smov [#allocation2]   ;;  %s34_s22 = int_to_ptr.vmem [resolvable:$true] %s33_s22 }
   0x4   :  { %36 = dma.hbm_to_vmem [thread:$0]  %s32_s20, 16, %s34_s22, [#allocation6]  }
   0x5   :  { %s19_s27 = sshll.u32 %s387_s26, 4  ;;  %s388_s28 = smov 128   ;;  %s20_s27 = int_to_ptr.vmem [resolvable:$true] %s19_s27 }
   0x6   :  { %s389_s29 = smov 8   ;;  %s43_s1 = sshll.u32 %s468_s3, 4  ;;  %s44_s1 = int_to_ptr.hbm [resolvable:$true] %s43_s1 }
   0x7   :  { %25 = dma.hbm_to_vmem [thread:$0]  %s18_s25, 256, %s20_s27, [#allocation3], %s388_s28, %s388_s28, %s389_s29  }
   0x8   :  { %s390_s7 = smov [#allocation7]   ;;  %s391_s9 = smov 256  }
   0x9   :  { %s45_s8 = sshll.u32 %s390_s7, 4  ;;  %s392_s10 = smov 16   ;;  %s46_s8 = int_to_ptr.vmem [resolvable:$true] %s45_s8 }
   0xa   :  { %51 = dma.hbm_to_vmem [thread:$0]  %s44_s1, 4096, %s46_s8, [#allocation6], %s391_s9, %s391_s9, %s392_s10  }
   0xb   :  { %380 = dma.done.wait [#allocation3], 256  }
   0xc   :  { %381 = vsyncadd [#allocation3], 4294967040 }
   0xd   :  { %382 = dma.done.wait [#allocation6], 4112  }
   0xe   :  { %383 = vsyncadd [#allocation6], 4294963184  ;;  %v67_v0 = vld [vmem:[#allocation2 + $0x8] sm:$0xff]  ;;  %v66_v1 = vld [vmem:[#allocation2] sm:$0xff]  ;;  %v393_v2 = vmov 128.0   ;;  %s221_s16 = sshll.u32 %s470_s5, 4  ;;  %s222_s16 = int_to_ptr.hbm [resolvable:$true] %s221_s16 }
   0xf   :  { %70 = vadd.xlane.f32.xlu0 %v67_v0  ;;  %278 = vrcp.f32 %v393_v2  ;;  %v157_v5 = vld [vmem:[#allocation7 + $0xf0] sm:$0xff]  ;;  %v158_v6 = vld [vmem:[#allocation7 + $0xf8] sm:$0xff]  ;;  %v155_v7 = vld [vmem:[#allocation7 + $0xe0] sm:$0xff] }
  0x10   :  { %235 = vmatpush.msra.mxu2 %v157_v5  ;;  %251 = vmatpush.msra.mxu3 %v158_v6  ;;  %v156_v8 = vld [vmem:[#allocation7 + $0xe8] sm:$0xff]  ;;  %v153_v21 = vld [vmem:[#allocation7 + $0xd0] sm:$0xff]  ;;  %v154_v22 = vld [vmem:[#allocation7 + $0xd8] sm:$0xff] }
  0x11   :  { %165 = vmatpush.msra.mxu0 %v157_v5  ;;  %188 = vmatpush.msra.mxu1 %v158_v6  ;;  %v151_v23 = vld [vmem:[#allocation7 + $0xc0] sm:$0xff]  ;;  %v152_v24 = vld [vmem:[#allocation7 + $0xc8] sm:$0xff]  ;;  %v149_v25 = vld [vmem:[#allocation7 + $0xb0] sm:$0xff] }
  0x12   :  { %236 = vmatpush.msra.mxu2 %v155_v7  ;;  %252 = vmatpush.msra.mxu3 %v156_v8  ;;  %v150_v26 = vld [vmem:[#allocation7 + $0xb8] sm:$0xff]  ;;  %v147_v27 = vld [vmem:[#allocation7 + $0xa0] sm:$0xff]  ;;  %v148_v28 = vld [vmem:[#allocation7 + $0xa8] sm:$0xff] }
  0x13   :  { %166 = vmatpush.msra.mxu0 %v155_v7  ;;  %189 = vmatpush.msra.mxu1 %v156_v8  ;;  %v145_v29 = vld [vmem:[#allocation7 + $0x90] sm:$0xff]  ;;  %v146_v30 = vld [vmem:[#allocation7 + $0x98] sm:$0xff]  ;;  %v143_v31 = vld [vmem:[#allocation7 + $0x80] sm:$0xff] }
  0x14   :  { %237 = vmatpush.msra.mxu2 %v153_v21  ;;  %253 = vmatpush.msra.mxu3 %v154_v22  ;;  %v144_v32 = vld [vmem:[#allocation7 + $0x88] sm:$0xff]  ;;  %v141_v33 = vld [vmem:[#allocation7 + $0x70] sm:$0xff]  ;;  %v142_v34 = vld [vmem:[#allocation7 + $0x78] sm:$0xff] }
  0x15   :  { %v279_v3 = vpop.eup %278  ;;  %167 = vmatpush.msra.mxu0 %v153_v21  ;;  %190 = vmatpush.msra.mxu1 %v154_v22  ;;  %v139_v35 = vld [vmem:[#allocation7 + $0x60] sm:$0xff]  ;;  %v140_v36 = vld [vmem:[#allocation7 + $0x68] sm:$0xff]  ;;  %v137_v37 = vld [vmem:[#allocation7 + $0x50] sm:$0xff] }
  0x16   :  { %v73_v4 = vmul.f32 128.0, %v279_v3  ;;  %vm77_vm0 = vweird.f32 %v279_v3  ;;  %238 = vmatpush.msra.mxu2 %v151_v23  ;;  %254 = vmatpush.msra.mxu3 %v152_v24  ;;  %v138_v38 = vld [vmem:[#allocation7 + $0x58] sm:$0xff]  ;;  %v135_v39 = vld [vmem:[#allocation7 + $0x40] sm:$0xff]  ;;  %v136_v40 = vld [vmem:[#allocation7 + $0x48] sm:$0xff] }
  0x17   :  { %68 = vadd.xlane.f32.xlu0 %v66_v1  ;;  %168 = vmatpush.msra.mxu0 %v151_v23  ;;  %v133_v41 = vld [vmem:[#allocation7 + $0x30] sm:$0xff]  ;;  %v134_v42 = vld [vmem:[#allocation7 + $0x38] sm:$0xff]  ;;  %v131_v43 = vld [vmem:[#allocation7 + $0x20] sm:$0xff] }
  0x18   :  { %v74_v9 = vsub.f32 1.0, %v73_v4  ;;  %191 = vmatpush.msra.mxu1 %v152_v24  ;;  %239 = vmatpush.msra.mxu2 %v149_v25  ;;  %v132_v44 = vld [vmem:[#allocation7 + $0x28] sm:$0xff]  ;;  %v129_v45 = vld [vmem:[#allocation7 + $0x10] sm:$0xff]  ;;  %v130_v46 = vld [vmem:[#allocation7 + $0x18] sm:$0xff] }
  0x19   :  { %255 = vmatpush.msra.mxu3 %v150_v26  ;;  %169 = vmatpush.msra.mxu0 %v149_v25  ;;  %v127_v47 = vld [vmem:[#allocation7] sm:$0xff]  ;;  %v128_v48 = vld [vmem:[#allocation7 + $0x8] sm:$0xff]  ;;  %v276_v63 = vld [vmem:[#allocation5] ss:$0 sm:$0xff] }
  0x1a   :  { %v75_v10 = vmul.f32 %v279_v3, %v74_v9  ;;  %192 = vmatpush.msra.mxu1 %v150_v26  ;;  %240 = vmatpush.msra.mxu2 %v147_v27 }
  0x1b   :  { %256 = vmatpush.msra.mxu3 %v148_v28  ;;  %170 = vmatpush.msra.mxu0 %v147_v27 }
  0x1c   :  { %v76_v11 = vadd.f32 %v279_v3, %v75_v10  ;;  %193 = vmatpush.msra.mxu1 %v148_v28  ;;  %241 = vmatpush.msra.mxu2 %v145_v29 }
  0x1d   :  { %257 = vmatpush.msra.mxu3 %v146_v30  ;;  %171 = vmatpush.msra.mxu0 %v145_v29 }
  0x1e   :  { %v437_v12 = vsel %vm77_vm0, %v279_v3, %v76_v11  ;;  %194 = vmatpush.msra.mxu1 %v146_v30  ;;  %242 = vmatpush.msra.mxu2 %v143_v31  ;;  %v277_v3 = vld [vmem:[%s467_s2] ss:$0 sm:$0xff]  ;;  %s394_s2 = smov [#allocation8]  }
  0x1f   :  { %258 = vmatpush.msra.mxu3 %v144_v32  ;;  %172 = vmatpush.msra.mxu0 %v143_v31  ;;  %s219_s13 = sshll.u32 %s394_s2, 4  ;;  %s220_s13 = int_to_ptr.vmem [resolvable:$true] %s219_s13 }
  0x20   :  { %195 = vmatpush.msra.mxu1 %v144_v32  ;;  %243 = vmatpush.msra.mxu2 %v141_v33 }
  0x21   :  { %259 = vmatpush.msra.mxu3 %v142_v34  ;;  %173 = vmatpush.msra.mxu0 %v141_v33 }
  0x22   :  { %196 = vmatpush.msra.mxu1 %v142_v34  ;;  %244 = vmatpush.msra.mxu2 %v139_v35 }
  0x23   :  { %260 = vmatpush.msra.mxu3 %v140_v36  ;;  %174 = vmatpush.msra.mxu0 %v139_v35 }
  0x24   :  { %197 = vmatpush.msra.mxu1 %v140_v36  ;;  %245 = vmatpush.msra.mxu2 %v137_v37 }
  0x25   :  { %261 = vmatpush.msra.mxu3 %v138_v38  ;;  %175 = vmatpush.msra.mxu0 %v137_v37 }
  0x26   :  { %198 = vmatpush.msra.mxu1 %v138_v38  ;;  %246 = vmatpush.msra.mxu2 %v135_v39 }
  0x27   :  { %262 = vmatpush.msra.mxu3 %v136_v40  ;;  %176 = vmatpush.msra.mxu0 %v135_v39 }
  0x28   :  { %199 = vmatpush.msra.mxu1 %v136_v40  ;;  %247 = vmatpush.msra.mxu2 %v133_v41 }
  0x29   :  { %263 = vmatpush.msra.mxu3 %v134_v42  ;;  %177 = vmatpush.msra.mxu0 %v133_v41 }
  0x2a   :  { %200 = vmatpush.msra.mxu1 %v134_v42  ;;  %248 = vmatpush.msra.mxu2 %v131_v43 }
  0x2b   :  { %264 = vmatpush.msra.mxu3 %v132_v44  ;;  %178 = vmatpush.msra.mxu0 %v131_v43 }
  0x2c   :  { %201 = vmatpush.msra.mxu1 %v132_v44  ;;  %249 = vmatpush.msra.mxu2 %v129_v45 }
  0x2d   :  { %265 = vmatpush.msra.mxu3 %v130_v46  ;;  %179 = vmatpush.msra.mxu0 %v129_v45 }
  0x2e   :  { %202 = vmatpush.msra.mxu1 %v130_v46  ;;  %250 = vmatpush.msra.mxu2 %v127_v47 }
  0x2f   :  { %266 = vmatpush.msra.mxu3 %v128_v48  ;;  %180 = vmatpush.msra.mxu0 %v127_v47 }
  0x30   :  { %203 = vmatpush.msra.mxu1 %v128_v48 }
  0x82   :  { %v71_v13 = vpop.xlane.xlu0 %70 }
  0x83   :  { %v80_v14 = vmul.f32 %v437_v12, %v71_v13  ;;  %v159_v13 = vld [vmem:[%s469_s4] sm:$0x3] }
  0x85   :  { %v440_v15 = vsub.f32 %v67_v0, %v80_v14  ;;  %v161_v14 = vperm.slane %v159_v13, 0 }
  0x87   :  { %v84_v16 = vmul.f32 %v440_v15, %v440_v15 }
  0x89   :  { %87 = vadd.xlane.f32.xlu1 %v84_v16 }
  0x8a   :  { %v69_v17 = vpop.xlane.xlu0 %68 }
  0x8b   :  { %v79_v18 = vmul.f32 %v437_v12, %v69_v17 }
  0x8d   :  { %v445_v19 = vsub.f32 %v66_v1, %v79_v18 }
  0x8f   :  { %v83_v20 = vmul.f32 %v445_v19, %v445_v19 }
  0x91   :  { %85 = vadd.xlane.f32.xlu1 %v83_v20 }
  0xfc   :  { %v88_v49 = vpop.xlane.xlu1 %87 }
  0xfd   :  { %v90_v50 = vmul.f32 %v88_v49, %v437_v12 }
  0xff   :  { %v92_v51 = vadd.f32 1e-05, %v90_v50 }
 0x101   :  { %280 = vrsqrt.f32 %v92_v51  ;;  %vm109_vm2 = vweird.f32 %v92_v51 }
 0x104   :  { %v86_v52 = vpop.xlane.xlu1 %85 }
 0x105   :  { %v89_v53 = vmul.f32 %v86_v52, %v437_v12 }
 0x107   :  { %v281_v54 = vpop.eup %280  ;;  %v91_v55 = vadd.f32 1e-05, %v89_v53 }
 0x108   :  { %v104_v56 = vmul.f32 %v281_v54, %v92_v51  ;;  %vm110_vm1 = vweird.f32 %v281_v54 }
 0x109   :  { %282 = vrsqrt.f32 %v91_v55  ;;  %vm111_vm3 = vmor %vm109_vm2, %vm110_vm1  ;;  %vm99_vm5 = vweird.f32 %v91_v55 }
 0x10a   :  { %v105_v57 = vmul.f32 %v281_v54, %v104_v56 }
 0x10c   :  { %v106_v58 = vmul.f32 0.5, %v105_v57 }
 0x10e   :  { %v107_v59 = vsub.f32 1.5, %v106_v58 }
 0x10f   :  { %v283_v60 = vpop.eup %282 }
 0x110   :  { %v108_v61 = vmul.f32 %v281_v54, %v107_v59  ;;  %v94_v62 = vmul.f32 %v283_v60, %v91_v55  ;;  %vm100_vm4 = vweird.f32 %v283_v60 }
 0x111   :  { %vm101_vm6 = vmor %vm99_vm5, %vm100_vm4 }
 0x112   :  { %v95_v0 = vmul.f32 %v283_v60, %v94_v62  ;;  %v112_v1 = vsel %vm111_vm3, %v281_v54, %v108_v61 }
 0x113   :  { %v114_v2 = vmul.f32 %v112_v1, %v440_v15  ;;  %v162_v15 = vperm.slane %v159_v13, 1 }
 0x114   :  { %v96_v4 = vmul.f32 0.5, %v95_v0 }
 0x115   :  { %v120_v5 = vmul.f32 %v276_v63, %v114_v2 }
 0x116   :  { %v97_v6 = vsub.f32 1.5, %v96_v4 }
 0x117   :  { %v126_v7 = vadd.f32 %v277_v3, %v120_v5 }
 0x118   :  { %v98_v8 = vmul.f32 %v283_v60, %v97_v6 }
 0x119   :  { %184 = vmatmul.f32.vlgmr.msra.gmra.mxu2 %v126_v7  ;;  %207 = vmatmul.f32.vlgmr.msra.gmra.mxu3 %v126_v7 }
 0x11a   :  { %v102_v9 = vsel %vm101_vm6, %v283_v60, %v98_v8 }
 0x11b   :  { %v113_v10 = vmul.f32 %v102_v9, %v445_v19 }
 0x11d   :  { %v119_v11 = vmul.f32 %v276_v63, %v113_v10 }
 0x11f   :  { %v125_v12 = vadd.f32 %v277_v3, %v119_v11 }
 0x121   :  { %181 = vmatmul.f32.vlgmr.msra.gmra.mxu0 %v125_v12  ;;  %204 = vmatmul.f32.vlgmr.msra.gmra.mxu1 %v125_v12 }
 0x19c   :  { %v185_v16 = vpop.f32.mrf.mxu2  ;;  %v208_v17 = vpop.f32.mrf.mxu3 }
 0x19d   :  { %v186_v18 = vadd.f32 %v185_v16, %v161_v14  ;;  %v209_v20 = vadd.f32 %v208_v17, %v162_v15 }
 0x19e   :  { %v182_v19 = vpop.f32.mrf.mxu0  ;;  %v205_v21 = vpop.f32.mrf.mxu1 }
 0x19f   :  { %213 = vst [vmem:[#allocation8 + $0x10] sm:$0xff] %v186_v18  ;;  %v183_v22 = vadd.f32 %v182_v19, %v161_v14  ;;  %v206_v23 = vadd.f32 %v205_v21, %v162_v15 }
 0x1a0   :  { %214 = vst [vmem:[#allocation8 + $0x18] sm:$0xff] %v209_v20 }
 0x1a1   :  { %211 = vst [vmem:[#allocation8] sm:$0xff] %v183_v22 }
 0x1a2   :  { %212 = vst [vmem:[#allocation8 + $0x8] sm:$0xff] %v206_v23 }
 0x1a3   :  { %227 = dma.vmem_to_hbm [thread:$0]  %s220_s13, 512, %s222_s16, [#allocation4], %s391_s9, %s391_s9, %s392_s10  }
 0x1a4   :  { %384 = dma.done.wait [#allocation4], 512  }
 0x1a5   :  { %385 = vsyncadd [#allocation4], 4294966784 }
 0x1a6   :  { %232 = vsyncpa [#allocation3], 1 }
 0x1a7   :  { %233 = vsyncpa [#allocation6], 1 }
 0x1a8   :  { %234 = vsyncpa [#allocation4], 1 }

</bundles_post_ra>
